<compile_context>
chip_gen: v5e
topology: v5e:2x2
jax: 0.10.0
libtpu: 0.0.40
codegen_flags: <defaults>
</compile_context>

<pallas_src>
import jax
import jax.numpy as jnp
from jax.experimental import pallas as pl
from jax.experimental.pallas import tpu as pltpu


def _round_up(x, m):
    return (x + m - 1) // m * m


# ----------------------------- Pallas kernel --------------------------------
def youtube_net_kernel(user_static_ref, seq_emb_ref, seq_len_ref, item_emb_ref,
                       w1a_ref, w1b_ref, b1_ref, w2_ref, b2_ref, out_ref):
    Bt, L, D = seq_emb_ref.shape

    # --- SequencePoolingLayer: masked sum over the sequence axis -------------
    t = jax.lax.broadcasted_iota(jnp.int32, (Bt, L), dimension=1)
    mask = (t < seq_len_ref[...]).astype(jnp.float32)                  # (Bt, L)
    pooled = jnp.sum(seq_emb_ref[...] * mask[:, :, None], axis=1)      # (Bt, D)

    # --- user MLP layer 1: relu(cat([static, pooled]) @ W1 + b1) -------------
    # Split-K matmul (K = 320 static + 64 pooled); both hit the MXU with f32
    # accumulation.  A single K=384 dot would need a minor-dim concat at a
    # non-128-aligned offset, so the split form is kept for robust lowering.
    h1 = jnp.dot(user_static_ref[...], w1a_ref[...],
                 preferred_element_type=jnp.float32)
    h1 = h1 + jnp.dot(pooled, w1b_ref[...], preferred_element_type=jnp.float32)
    h1 = jnp.maximum(h1 + b1_ref[...], 0.0)                            # (Bt, H1)

    # --- user MLP layer 2 -----------------------------------------------------
    h2 = jnp.dot(h1, w2_ref[...], preferred_element_type=jnp.float32)
    h2 = jnp.maximum(h2 + b2_ref[...], 0.0)                            # (Bt, D)

    # --- user . item scores + softmax over the NI candidate items ------------
    # TODO(synk): NI*D MACs stay on VPU+XLU; negligible next to the MLP dots.
    scores = jnp.sum(h2[:, None, :] * item_emb_ref[...], axis=-1)      # (Bt, NI)
    m = jnp.max(scores, axis=-1, keepdims=True)
    e = jnp.exp(scores - m)
    inv = pl.reciprocal(jnp.sum(e, axis=-1, keepdims=True), approx=True)
    out_ref[...] = e * inv                                             # (Bt, NI)


# ------------------------------ glue (plain JAX) -----------------------------
def _embedding_glue(params, user_id, gender, age, occupation, zip_code,
                    seq, seq_len, pos, neg):
    take = lambda tbl, idx: jnp.take(tbl, idx, axis=0)
    user_static = jnp.concatenate(
        [take(params["user_emb"], user_id),
         take(params["gender_emb"], gender),
         take(params["age_emb"], age),
         take(params["occupation_emb"], occupation),
         take(params["zip_emb"], zip_code)], axis=-1)                  # (B, 5D)
    seq_emb = take(params["item_emb"], seq)                            # (B, L, D)
    item_emb = jnp.concatenate(
        [take(params["item_emb"], pos),                                # (B, 1, D)
         take(params["item_emb"], neg)], axis=1)                       # (B, NI, D)
    return user_static, seq_emb, item_emb, seq_len.reshape(-1, 1).astype(jnp.int32)


@jax.jit
def youtube_net_forward(params, user_id, gender, age, occupation, zip_code,
                        user_click_item_seq, user_click_item_seq_length,
                        pos_item_sample, neg_item_sample):
    D = params["user_emb"].shape[-1]
    user_static, seq_emb, item_emb, seq_len = _embedding_glue(
        params, user_id, gender, age, occupation, zip_code,
        user_click_item_seq, user_click_item_seq_length,
        pos_item_sample, neg_item_sample)

    B, S5 = user_static.shape
    L = seq_emb.shape[1]
    NI = item_emb.shape[1]
    H1 = params["w1"].shape[1]
    H2 = params["w2"].shape[1]

    # Batch tile: up to 128 rows per grid step (fits v5e's 16 MiB scoped VMEM
    # default and v7x's smaller physical VMEM with double-buffering headroom).
    Bt = min(128, _round_up(B, 8))
    B_pad = _round_up(B, Bt)
    pad = B_pad - B
    if pad:
        user_static = jnp.pad(user_static, ((0, pad), (0, 0)))
        seq_emb = jnp.pad(seq_emb, ((0, pad), (0, 0), (0, 0)))
        item_emb = jnp.pad(item_emb, ((0, pad), (0, 0), (0, 0)))
        seq_len = jnp.pad(seq_len, ((0, pad), (0, 0)))

    w1a, w1b = params["w1"][: 5 * D], params["w1"][5 * D:]
    b1 = params["b1"].reshape(1, -1)
    b2 = params["b2"].reshape(1, -1)

    batch2 = lambda i: (i, 0)
    batch3 = lambda i: (i, 0, 0)
    const2 = lambda i: (0, 0)          # weights: same block every step -> resident

    grid_spec = pltpu.PrefetchScalarGridSpec(
        num_scalar_prefetch=0,
        grid=(B_pad // Bt,),
        in_specs=[
            pl.BlockSpec((Bt, S5), batch2),        # user_static
            pl.BlockSpec((Bt, L, D), batch3),      # seq_emb
            pl.BlockSpec((Bt, 1), batch2),         # seq_len
            pl.BlockSpec((Bt, NI, D), batch3),     # item_emb
            pl.BlockSpec((5 * D, H1), const2),     # w1a   (VMEM-resident)
            pl.BlockSpec((D, H1), const2),         # w1b   (VMEM-resident)
            pl.BlockSpec((1, H1), const2),         # b1    (VMEM-resident)
            pl.BlockSpec((H1, H2), const2),        # w2    (VMEM-resident)
            pl.BlockSpec((1, H2), const2),         # b2    (VMEM-resident)
        ],
        out_specs=pl.BlockSpec((Bt, NI), batch2),
    )

    probs = pl.pallas_call(
        youtube_net_kernel,
        out_shape=jax.ShapeDtypeStruct((B_pad, NI), jnp.float32),
        grid_spec=grid_spec,
        compiler_params=pltpu.CompilerParams(
            dimension_semantics=("parallel",)),
    )(user_static, seq_emb, seq_len, item_emb,
      w1a, w1b, b1, params["w2"], b2)

    return probs[:B].reshape(B, 1, NI)


# ------------------------------ pure-JAX reference ---------------------------
def reference_forward(params, user_id, gender, age, occupation, zip_code,
                      seq, seq_len, pos, neg):
    user_static, seq_emb, item_emb, seq_len2 = _embedding_glue(
        params, user_id, gender, age, occupation, zip_code,
        seq, seq_len, pos, neg)
    L = seq_emb.shape[1]
    mask = (jnp.arange(L)[None, :] < seq_len2).astype(jnp.float32)
    pooled = jnp.sum(seq_emb * mask[:, :, None], axis=1)
    u = jnp.concatenate([user_static, pooled], axis=-1)
    u = jnp.maximum(u @ params["w1"] + params["b1"], 0.0)
    u = jnp.maximum(u @ params["w2"] + params["b2"], 0.0)
    scores = jnp.einsum("bd,bjd->bj", u, item_emb)
    return jax.nn.softmax(scores, axis=-1)[:, None, :]


# ------------------------------ parameter init -------------------------------
def init_params(key, embedding_dim=64):
    D = embedding_dim
    H1, H2 = 6 * D, D          # see NOTE above: only self-consistent hidden sizes
    ks = jax.random.split(key, 10)
    emb = lambda k, n: jax.random.normal(k, (n, D), jnp.float32)       # nn.Embedding ~ N(0,1)
    lin = lambda k, fi, fo: jax.random.uniform(
        k, (fi, fo), jnp.float32, -1.0 / jnp.sqrt(fi), 1.0 / jnp.sqrt(fi))
    return {
        "user_emb": emb(ks[0], 6040 + 1),
        "gender_emb": emb(ks[1], 2 + 1),
        "age_emb": emb(ks[2], 7 + 1),
        "occupation_emb": emb(ks[3], 21 + 1),
        "zip_emb": emb(ks[4], 3439 + 1),
        "item_emb": emb(ks[5], 3706 + 1),
        "w1": lin(ks[6], 6 * D, H1),
        "b1": jax.random.uniform(ks[7], (H1,), jnp.float32,
                                 -1.0 / jnp.sqrt(6 * D), 1.0 / jnp.sqrt(6 * D)),
        "w2": lin(ks[8], H1, H2),
        "b2": jax.random.uniform(ks[9], (H2,), jnp.float32,
                                 -1.0 / jnp.sqrt(H1), 1.0 / jnp.sqrt(H1)),
    }


# ----------------------------------- main ------------------------------------
if __name__ == "__main__":
    key = jax.random.PRNGKey(0)
    pkey, dkey = jax.random.split(key)
    params = init_params(pkey, embedding_dim=64)

    B, L, NEG = 2, 8, 5
    dk = jax.random.split(dkey, 9)
    user_id = jax.random.randint(dk[0], (B,), 0, 6041)
    gender = jax.random.randint(dk[1], (B,), 0, 3)
    age = jax.random.randint(dk[2], (B,), 0, 8)
    occupation = jax.random.randint(dk[3], (B,), 0, 22)
    zip_code = jax.random.randint(dk[4], (B,), 0, 3440)
    user_click_item_seq = jax.random.randint(dk[5], (B, L), 0, 3707)
    user_click_item_seq_length = jax.random.randint(dk[6], (B,), 1, L + 1)
    pos_item_sample = jax.random.randint(dk[7], (B, 1), 0, 3707)
    neg_item_sample = jax.random.randint(dk[8], (B, NEG), 0, 3707)

    out = youtube_net_forward(params, user_id, gender, age, occupation, zip_code,
                              user_click_item_seq, user_click_item_seq_length,
                              pos_item_sample, neg_item_sample)
    out = jax.block_until_ready(out)

    ref = reference_forward(params, user_id, gender, age, occupation, zip_code,
                            user_click_item_seq, user_click_item_seq_length,
                            pos_item_sample, neg_item_sample)
    assert out.shape == (B, 1, 1 + NEG), out.shape
    assert jnp.allclose(out, ref, atol=1e-3, rtol=1e-3), float(jnp.max(jnp.abs(out - ref)))

    print("KERNEL_OK")
</pallas_src>

<mosaic_0001>
module attributes {stable_mosaic.version = 11 : i64} {
  func.func @youtube_net_kernel(%arg0: i32, %arg1: memref<8x320xf32, #tpu.memory_space<vmem>>, %arg2: memref<8x8x64xf32, #tpu.memory_space<vmem>>, %arg3: memref<8x1xi32, #tpu.memory_space<vmem>>, %arg4: memref<8x6x64xf32, #tpu.memory_space<vmem>>, %arg5: memref<320x384xf32, #tpu.memory_space<vmem>>, %arg6: memref<64x384xf32, #tpu.memory_space<vmem>>, %arg7: memref<1x384xf32, #tpu.memory_space<vmem>>, %arg8: memref<384x64xf32, #tpu.memory_space<vmem>>, %arg9: memref<1x64xf32, #tpu.memory_space<vmem>>, %arg10: memref<8x6xf32, #tpu.memory_space<vmem>>) attributes {dimension_semantics = [#tpu.dimension_semantics<parallel>], iteration_bounds = array<i64: 1>, scalar_prefetch = 0 : i64, scratch_operands = 0 : i64, tpu.core_type = #tpu.core_type<tc>, window_params = [{transform_indices = @transform_0, window_bounds = array<i64: 8, 320>}, {transform_indices = @transform_1, window_bounds = array<i64: 8, 8, 64>}, {transform_indices = @transform_2, window_bounds = array<i64: 8, 1>}, {transform_indices = @transform_3, window_bounds = array<i64: 8, 6, 64>}, {pipeline_mode = #tpu.pipeline_mode<synchronous>, transform_indices = @transform_4, window_bounds = array<i64: 320, 384>}, {pipeline_mode = #tpu.pipeline_mode<synchronous>, transform_indices = @transform_5, window_bounds = array<i64: 64, 384>}, {pipeline_mode = #tpu.pipeline_mode<synchronous>, transform_indices = @transform_6, window_bounds = array<i64: 1, 384>}, {pipeline_mode = #tpu.pipeline_mode<synchronous>, transform_indices = @transform_7, window_bounds = array<i64: 384, 64>}, {pipeline_mode = #tpu.pipeline_mode<synchronous>, transform_indices = @transform_8, window_bounds = array<i64: 1, 64>}, {transform_indices = @transform_9, window_bounds = array<i64: 8, 6>}]} {
    %0 = tpu.iota {dimensions = array<i32: 1>} : vector<8x8xi32>
    %c0 = arith.constant 0 : index
    %c0_0 = arith.constant 0 : index
    %1 = vector.load %arg3[%c0, %c0_0] : memref<8x1xi32, #tpu.memory_space<vmem>>, vector<8x1xi32>
    %2 = vector.broadcast %1 : vector<8x1xi32> to vector<8x8xi32>
    %3 = arith.cmpi slt, %0, %2 : vector<8x8xi32>
    %4 = arith.extui %3 : vector<8x8xi1> to vector<8x8xi32>
    %5 = arith.sitofp %4 : vector<8x8xi32> to vector<8x8xf32>
    %c0_1 = arith.constant 0 : index
    %c0_2 = arith.constant 0 : index
    %c0_3 = arith.constant 0 : index
    %6 = vector.load %arg2[%c0_1, %c0_2, %c0_3] : memref<8x8x64xf32, #tpu.memory_space<vmem>>, vector<8x8x64xf32>
    %7 = vector.shape_cast %5 : vector<8x8xf32> to vector<8x8x1xf32>
    %8 = vector.broadcast %7 : vector<8x8x1xf32> to vector<8x8x64xf32>
    %9 = arith.mulf %6, %8 : vector<8x8x64xf32>
    %cst = arith.constant dense<0.000000e+00> : vector<8x64xf32>
    %10 = vector.multi_reduction <add>, %9, %cst [1] : vector<8x8x64xf32> to vector<8x64xf32>
    %c0_4 = arith.constant 0 : index
    %c0_5 = arith.constant 0 : index
    %11 = vector.load %arg1[%c0_4, %c0_5] : memref<8x320xf32, #tpu.memory_space<vmem>>, vector<8x320xf32>
    %c0_6 = arith.constant 0 : index
    %c0_7 = arith.constant 0 : index
    %12 = vector.load %arg5[%c0_6, %c0_7] : memref<320x384xf32, #tpu.memory_space<vmem>>, vector<320x384xf32>
    %cst_8 = arith.constant dense<0.000000e+00> : vector<8x384xf32>
    %13 = tpu.matmul %11, %12, %cst_8 {dimension_numbers = #tpu.dot_dimension_numbers<[1], [0], [0], [1], [0, 0, 1, 1], [], []>} : vector<8x320xf32>, vector<320x384xf32>, vector<8x384xf32> -> vector<8x384xf32>
    %c0_9 = arith.constant 0 : index
    %c0_10 = arith.constant 0 : index
    %14 = vector.load %arg6[%c0_9, %c0_10] : memref<64x384xf32, #tpu.memory_space<vmem>>, vector<64x384xf32>
    %cst_11 = arith.constant dense<0.000000e+00> : vector<8x384xf32>
    %15 = tpu.matmul %10, %14, %cst_11 {dimension_numbers = #tpu.dot_dimension_numbers<[1], [0], [0], [1], [0, 0, 1, 1], [], []>} : vector<8x64xf32>, vector<64x384xf32>, vector<8x384xf32> -> vector<8x384xf32>
    %16 = arith.addf %13, %15 : vector<8x384xf32>
    %c0_12 = arith.constant 0 : index
    %c0_13 = arith.constant 0 : index
    %17 = vector.load %arg7[%c0_12, %c0_13] : memref<1x384xf32, #tpu.memory_space<vmem>>, vector<1x384xf32>
    %18 = vector.broadcast %17 : vector<1x384xf32> to vector<8x384xf32>
    %19 = arith.addf %16, %18 : vector<8x384xf32>
    %cst_14 = arith.constant 0.000000e+00 : f32
    %20 = vector.broadcast %cst_14 : f32 to vector<8x384xf32>
    %21 = arith.maximumf %19, %20 : vector<8x384xf32>
    %c0_15 = arith.constant 0 : index
    %c0_16 = arith.constant 0 : index
    %22 = vector.load %arg8[%c0_15, %c0_16] : memref<384x64xf32, #tpu.memory_space<vmem>>, vector<384x64xf32>
    %cst_17 = arith.constant dense<0.000000e+00> : vector<8x64xf32>
    %23 = tpu.matmul %21, %22, %cst_17 {dimension_numbers = #tpu.dot_dimension_numbers<[1], [0], [0], [1], [0, 0, 1, 1], [], []>} : vector<8x384xf32>, vector<384x64xf32>, vector<8x64xf32> -> vector<8x64xf32>
    %c0_18 = arith.constant 0 : index
    %c0_19 = arith.constant 0 : index
    %24 = vector.load %arg9[%c0_18, %c0_19] : memref<1x64xf32, #tpu.memory_space<vmem>>, vector<1x64xf32>
    %25 = vector.broadcast %24 : vector<1x64xf32> to vector<8x64xf32>
    %26 = arith.addf %23, %25 : vector<8x64xf32>
    %cst_20 = arith.constant 0.000000e+00 : f32
    %27 = vector.broadcast %cst_20 : f32 to vector<8x64xf32>
    %28 = arith.maximumf %26, %27 : vector<8x64xf32>
    %29 = vector.shape_cast %28 : vector<8x64xf32> to vector<8x1x64xf32>
    %c0_21 = arith.constant 0 : index
    %c0_22 = arith.constant 0 : index
    %c0_23 = arith.constant 0 : index
    %30 = vector.load %arg4[%c0_21, %c0_22, %c0_23] : memref<8x6x64xf32, #tpu.memory_space<vmem>>, vector<8x6x64xf32>
    %31 = vector.broadcast %29 : vector<8x1x64xf32> to vector<8x6x64xf32>
    %32 = arith.mulf %31, %30 : vector<8x6x64xf32>
    %cst_24 = arith.constant dense<0.000000e+00> : vector<8x6xf32>
    %33 = vector.multi_reduction <add>, %32, %cst_24 [2] : vector<8x6x64xf32> to vector<8x6xf32>
    %cst_25 = arith.constant dense<0xFF800000> : vector<8xf32>
    %34 = vector.multi_reduction <maximumf>, %33, %cst_25 [1] : vector<8x6xf32> to vector<8xf32>
    %35 = vector.shape_cast %34 : vector<8xf32> to vector<8x1xf32>
    %36 = vector.broadcast %35 : vector<8x1xf32> to vector<8x6xf32>
    %37 = arith.subf %33, %36 : vector<8x6xf32>
    %38 = math.exp %37 : vector<8x6xf32>
    %cst_26 = arith.constant dense<0.000000e+00> : vector<8xf32>
    %39 = vector.multi_reduction <add>, %38, %cst_26 [1] : vector<8x6xf32> to vector<8xf32>
    %40 = vector.shape_cast %39 : vector<8xf32> to vector<8x1xf32>
    %41 = tpu.reciprocal %40 {approx = true} : vector<8x1xf32> -> vector<8x1xf32>
    %42 = vector.broadcast %41 : vector<8x1xf32> to vector<8x6xf32>
    %43 = arith.mulf %38, %42 : vector<8x6xf32>
    %c0_27 = arith.constant 0 : index
    %c0_28 = arith.constant 0 : index
    %44 = vector.load %arg10[%c0_27, %c0_28] : memref<8x6xf32, #tpu.memory_space<vmem>>, vector<8x6xf32>
    tpu.vector_store %arg10[%c0_27, %c0_28], %43 {strides = array<i32>} : memref<8x6xf32, #tpu.memory_space<vmem>>, vector<8x6xf32>,
    return
  }
  func.func @transform_0(%arg0: i32) -> (i32, i32) {
    %c0_i32 = arith.constant 0 : i32
    %c0_i32_0 = arith.constant 0 : i32
    return %arg0, %c0_i32 : i32, i32
  }
  func.func @transform_1(%arg0: i32) -> (i32, i32, i32) {
    %c0_i32 = arith.constant 0 : i32
    %c0_i32_0 = arith.constant 0 : i32
    %c0_i32_1 = arith.constant 0 : i32
    return %arg0, %c0_i32, %c0_i32_0 : i32, i32, i32
  }
  func.func @transform_2(%arg0: i32) -> (i32, i32) {
    %c0_i32 = arith.constant 0 : i32
    %c0_i32_0 = arith.constant 0 : i32
    return %arg0, %c0_i32 : i32, i32
  }
  func.func @transform_3(%arg0: i32) -> (i32, i32, i32) {
    %c0_i32 = arith.constant 0 : i32
    %c0_i32_0 = arith.constant 0 : i32
    %c0_i32_1 = arith.constant 0 : i32
    return %arg0, %c0_i32, %c0_i32_0 : i32, i32, i32
  }
  func.func @transform_4(%arg0: i32) -> (i32, i32) {
    %c0_i32 = arith.constant 0 : i32
    %c0_i32_0 = arith.constant 0 : i32
    %c0_i32_1 = arith.constant 0 : i32
    return %c0_i32, %c0_i32_0 : i32, i32
  }
  func.func @transform_5(%arg0: i32) -> (i32, i32) {
    %c0_i32 = arith.constant 0 : i32
    %c0_i32_0 = arith.constant 0 : i32
    %c0_i32_1 = arith.constant 0 : i32
    return %c0_i32, %c0_i32_0 : i32, i32
  }
  func.func @transform_6(%arg0: i32) -> (i32, i32) {
    %c0_i32 = arith.constant 0 : i32
    %c0_i32_0 = arith.constant 0 : i32
    %c0_i32_1 = arith.constant 0 : i32
    return %c0_i32, %c0_i32_0 : i32, i32
  }
  func.func @transform_7(%arg0: i32) -> (i32, i32) {
    %c0_i32 = arith.constant 0 : i32
    %c0_i32_0 = arith.constant 0 : i32
    %c0_i32_1 = arith.constant 0 : i32
    return %c0_i32, %c0_i32_0 : i32, i32
  }
  func.func @transform_8(%arg0: i32) -> (i32, i32) {
    %c0_i32 = arith.constant 0 : i32
    %c0_i32_0 = arith.constant 0 : i32
    %c0_i32_1 = arith.constant 0 : i32
    return %c0_i32, %c0_i32_0 : i32, i32
  }
  func.func @transform_9(%arg0: i32) -> (i32, i32) {
    %c0_i32 = arith.constant 0 : i32
    %c0_i32_0 = arith.constant 0 : i32
    return %arg0, %c0_i32 : i32, i32
  }
}

</mosaic_0001>

<bundles_post_ra>
// kernel: youtube_net_forward.1
= control target key start
LH: loop header
LB: loop body
LE: loop exit
PB: predicated region body
PF: predicated region fallthrough
CT: control target
= control target key end

     0   :  { %v32_v0 = vlaneseq  ;;  %v1030_v1 = vmov 0   ;;  %v1031_v6 = vmov 0.0   ;;  %vm113_vm1 = vcmask 523264   ;;  %s1831_s2 = inlined_call_operand.vmem [shape: s32[8,1], index: 2, kind: input, shape index: {}]   ;;  %s1832_s4 = inlined_call_operand.vmem [shape: f32[320,384], index: 4, kind: input, shape index: {}]   ;;  %s1833_s5 = inlined_call_operand.vmem [shape: f32[64,384], index: 5, kind: input, shape index: {}]   ;;  %s1834_s1 = inlined_call_operand.vmem [shape: f32[8,8,64], index: 1, kind: input, shape index: {}]   ;;  %s1835_s0 = inlined_call_operand.vmem [shape: f32[8,320], index: 0, kind: input, shape index: {}]   ;;  %s1836_s7 = inlined_call_operand.vmem [shape: f32[384,64], index: 7, kind: input, shape index: {}]   ;;  %s1837_s8 = inlined_call_operand.vmem [shape: f32[1,64], index: 8, kind: input, shape index: {}]   ;;  %s1838_s6 = inlined_call_operand.vmem [shape: f32[1,384], index: 6, kind: input, shape index: {}]   ;;  %s1839_s3 = inlined_call_operand.vmem [shape: f32[8,6,64], index: 3, kind: input, shape index: {}]   ;;  %s1840_s9 = inlined_call_operand.vmem [shape: f32[8,6], index: 9, kind: output, shape index: {}]  }
   0x1   :  { %984 = vset.pattern.permute.xlu0 %v1030_v1  ;;  %v34_v2 = vld [vmem:[%s1831_s2] sm:$0xff]  ;;  %v266_v20 = vld [vmem:[%s1832_s4 + $0x2e8] sm:$0xff]  ;;  %v263_v21 = vld [vmem:[%s1832_s4 + $0x2d0] sm:$0xff]  ;;  %vm325_vm2 = vcmask 1041409   ;;  %vm327_vm3 = vcmask 1042434   ;;  %vm329_vm4 = vcmask 1043459  }
   0x2   :  { %36 = vperm.xlu0 %984, %v34_v2   ;;  %v51_v3 = vshrl.u32 %v32_v0, 7  ;;  %v1085_v4 = vand.u32 127, %v32_v0  ;;  %424 = vmatpush.msra.mxu0 %v266_v20  ;;  %v260_v22 = vld [vmem:[%s1832_s4 + $0x2b8] sm:$0xff]  ;;  %v257_v23 = vld [vmem:[%s1832_s4 + $0x2a0] sm:$0xff]  ;;  %v254_v24 = vld [vmem:[%s1832_s4 + $0x288] sm:$0xff]  ;;  %vm331_vm5 = vcmask 1044484  }
   0x3   :  { %v251_v25 = vld [vmem:[%s1832_s4 + $0x270] sm:$0xff]  ;;  %v218_v26 = vld [vmem:[%s1832_s4 + $0x168] sm:$0xff]  ;;  %v248_v28 = vld [vmem:[%s1832_s4 + $0x258] sm:$0xff]  ;;  %vm333_vm6 = vcmask 1045509   ;;  %vm335_vm7 = vcmask 1046534   ;;  %vm337_vm8 = vcmask 1047559  }
   0x4   :  { %1002 = vset.pattern.permute.xlu2 %v51_v3  ;;  %991 = vset.pattern.permute.xlu1 %v51_v3  ;;  %v314_v27 = vld [vmem:[%s1833_s5 + $0xa8] sm:$0xff]  ;;  %v245_v29 = vld [vmem:[%s1832_s4 + $0x240] sm:$0xff]  ;;  %v239_v31 = vld [vmem:[%s1832_s4 + $0x210] sm:$0xff]  ;;  %vm751_vm9 = vcmask 521216   ;;  %vm800_vm10 = vcmask 48128  }
   0x5   :  { %425 = vmatpush.msra.mxu0 %v263_v21  ;;  %404 = vmatpush.msra.mxu3 %v218_v26  ;;  %v242_v30 = vld [vmem:[%s1832_s4 + $0x228] sm:$0xff]  ;;  %v215_v32 = vld [vmem:[%s1832_s4 + $0x150] sm:$0xff]  ;;  %v236_v34 = vld [vmem:[%s1832_s4 + $0x1f8] sm:$0xff] }
   0x6   :  { %349 = vmatpush.msra.mxu2 %v314_v27  ;;  %v311_v33 = vld [vmem:[%s1833_s5 + $0x90] sm:$0xff]  ;;  %v212_v35 = vld [vmem:[%s1832_s4 + $0x138] sm:$0xff]  ;;  %v233_v37 = vld [vmem:[%s1832_s4 + $0x1e0] sm:$0xff] }
   0x7   :  { %426 = vmatpush.msra.mxu0 %v260_v22  ;;  %405 = vmatpush.msra.mxu3 %v215_v32  ;;  %v308_v36 = vld [vmem:[%s1833_s5 + $0x78] sm:$0xff]  ;;  %v209_v38 = vld [vmem:[%s1832_s4 + $0x120] sm:$0xff]  ;;  %v230_v40 = vld [vmem:[%s1832_s4 + $0x1c8] sm:$0xff] }
   0x8   :  { %350 = vmatpush.msra.mxu2 %v311_v33  ;;  %v305_v39 = vld [vmem:[%s1833_s5 + $0x60] sm:$0xff]  ;;  %v206_v41 = vld [vmem:[%s1832_s4 + $0x108] sm:$0xff]  ;;  %v315_v43 = vld [vmem:[%s1833_s5 + $0xb0] sm:$0xff] }
   0x9   :  { %427 = vmatpush.msra.mxu0 %v257_v23  ;;  %406 = vmatpush.msra.mxu3 %v212_v35  ;;  %v302_v42 = vld [vmem:[%s1833_s5 + $0x48] sm:$0xff]  ;;  %v227_v44 = vld [vmem:[%s1832_s4 + $0x1b0] sm:$0xff]  ;;  %v312_v47 = vld [vmem:[%s1833_s5 + $0x98] sm:$0xff] }
   0xa   :  { %985 = vset.pattern.permute.xlu0 %v51_v3  ;;  %351 = vmatpush.msra.mxu2 %v308_v36  ;;  %v203_v45 = vld [vmem:[%s1832_s4 + $0xf0] sm:$0xff]  ;;  %v224_v48 = vld [vmem:[%s1832_s4 + $0x198] sm:$0xff]  ;;  %v309_v51 = vld [vmem:[%s1833_s5 + $0x80] sm:$0xff] }
   0xb   :  { %428 = vmatpush.msra.mxu0 %v254_v24  ;;  %407 = vmatpush.msra.mxu3 %v209_v38  ;;  %v299_v46 = vld [vmem:[%s1833_s5 + $0x30] sm:$0xff]  ;;  %v200_v49 = vld [vmem:[%s1832_s4 + $0xd8] sm:$0xff]  ;;  %v221_v52 = vld [vmem:[%s1832_s4 + $0x180] sm:$0xff] }
   0xc   :  { %352 = vmatpush.msra.mxu2 %v305_v39  ;;  %369 = vmatpush.msra.mxu1 %v315_v43  ;;  %v296_v50 = vld [vmem:[%s1833_s5 + $0x18] sm:$0xff]  ;;  %v197_v53 = vld [vmem:[%s1832_s4 + $0xc0] sm:$0xff]  ;;  %v306_v56 = vld [vmem:[%s1833_s5 + $0x68] sm:$0xff] }
   0xd   :  { %429 = vmatpush.msra.mxu0 %v251_v25  ;;  %408 = vmatpush.msra.mxu3 %v206_v41  ;;  %v220_v54 = vld [vmem:[%s1832_s4 + $0x178] sm:$0xff]  ;;  %v293_v55 = vld [vmem:[%s1833_s5] sm:$0xff]  ;;  %v194_v58 = vld [vmem:[%s1832_s4 + $0xa8] sm:$0xff] }
   0xe   :  { %353 = vmatpush.msra.mxu2 %v302_v42  ;;  %370 = vmatpush.msra.mxu1 %v312_v47  ;;  %v316_v57 = vld [vmem:[%s1833_s5 + $0xb8] sm:$0xff]  ;;  %v217_v59 = vld [vmem:[%s1832_s4 + $0x160] sm:$0xff]  ;;  %v303_v60 = vld [vmem:[%s1833_s5 + $0x50] sm:$0xff] }
   0xf   :  { %430 = vmatpush.msra.mxu0 %v248_v28  ;;  %409 = vmatpush.msra.mxu3 %v203_v45  ;;  %v313_v61 = vld [vmem:[%s1833_s5 + $0xa0] sm:$0xff]  ;;  %v191_v62 = vld [vmem:[%s1832_s4 + $0x90] sm:$0xff]  ;;  %v214_v63 = vld [vmem:[%s1832_s4 + $0x148] sm:$0xff] }
  0x10   :  { %354 = vmatpush.msra.mxu2 %v299_v46  ;;  %371 = vmatpush.msra.mxu1 %v309_v51  ;;  %v300_v0 = vld [vmem:[%s1833_s5 + $0x38] sm:$0xff]  ;;  %v211_v3 = vld [vmem:[%s1832_s4 + $0x130] sm:$0xff]  ;;  %v173_v28 = vld [vmem:[%s1832_s4] sm:$0xff] }
  0x11   :  { %431 = vmatpush.msra.mxu0 %v245_v29  ;;  %410 = vmatpush.msra.mxu3 %v200_v49  ;;  %v188_v2 = vld [vmem:[%s1832_s4 + $0x78] sm:$0xff]  ;;  %v47_v22 = vld [vmem:[%s1834_s1 + $0x30] sm:$0xff]  ;;  %v281_v29 = vld [vmem:[%s1832_s4 + $0x360] sm:$0xff] }
  0x12   :  { %355 = vmatpush.msra.mxu2 %v296_v50  ;;  %372 = vmatpush.msra.mxu1 %v306_v56  ;;  %v176_v23 = vld [vmem:[%s1832_s4 + $0x18] sm:$0xff]  ;;  %v199_v26 = vld [vmem:[%s1832_s4 + $0xd0] sm:$0xff]  ;;  %v1304_v33 = vld [vmem:[%s1835_s0] sm:$0xff] }
  0x13   :  { %432 = vmatpush.msra.mxu0 %v242_v30  ;;  %411 = vmatpush.msra.mxu3 %v197_v53  ;;  %v284_v24 = vld [vmem:[%s1832_s4 + $0x378] sm:$0xff]  ;;  %v295_v27 = vld [vmem:[%s1833_s5 + $0x10] sm:$0xff]  ;;  %v193_v35 = vld [vmem:[%s1832_s4 + $0xa0] sm:$0xff] }
  0x14   :  { %356 = vmatpush.msra.mxu2 %v293_v55  ;;  %373 = vmatpush.msra.mxu1 %v303_v60  ;;  %v48_v25 = vld [vmem:[%s1834_s1 + $0x38] sm:$0xff]  ;;  %v41_v39 = vld [vmem:[%s1834_s1] sm:$0xff]  ;;  %v42_v43 = vld [vmem:[%s1834_s1 + $0x8] sm:$0xff] }
  0x15   :  { %433 = vmatpush.msra.mxu0 %v239_v31  ;;  %412 = vmatpush.msra.mxu3 %v194_v58  ;;  %v196_v30 = vld [vmem:[%s1832_s4 + $0xb8] sm:$0xff]  ;;  %v190_v45 = vld [vmem:[%s1832_s4 + $0x88] sm:$0xff]  ;;  %v187_v53 = vld [vmem:[%s1832_s4 + $0x70] sm:$0xff] }
  0x16   :  { %389 = vmatpush.msrb.mxu2 %v316_v57  ;;  %374 = vmatpush.msra.mxu1 %v300_v0  ;;  %v44_v38 = vld [vmem:[%s1834_s1 + $0x18] sm:$0xff] }
  0x17   :  { %434 = vmatpush.msra.mxu0 %v236_v34  ;;  %413 = vmatpush.msra.mxu3 %v191_v62  ;;  %v278_v34 = vld [vmem:[%s1832_s4 + $0x348] sm:$0xff]  ;;  %v184_v62 = vld [vmem:[%s1832_s4 + $0x58] sm:$0xff] }
  0x18   :  { %390 = vmatpush.msrb.mxu2 %v313_v61  ;;  %v269_v61 = vld [vmem:[%s1832_s4 + $0x300] sm:$0xff] }
  0x19   :  { %435 = vmatpush.msra.mxu0 %v233_v37  ;;  %414 = vmatpush.msra.mxu3 %v188_v2  ;;  %v43_v37 = vld [vmem:[%s1834_s1 + $0x10] sm:$0xff] }
  0x1b   :  { %436 = vmatpush.msra.mxu0 %v230_v40 }
  0x1d   :  { %437 = vmatpush.msra.mxu0 %v227_v44  ;;  %v275_v44 = vld [vmem:[%s1832_s4 + $0x330] sm:$0xff] }
  0x1f   :  { %438 = vmatpush.msra.mxu0 %v224_v48 }
  0x21   :  { %439 = vmatpush.msra.mxu0 %v221_v52  ;;  %v272_v52 = vld [vmem:[%s1832_s4 + $0x318] sm:$0xff] }
  0x23   :  { %524 = vmatpush.msrb.mxu0 %v220_v54  ;;  %v1342_v54 = vld [vmem:[%s1835_s0 + $0x8] sm:$0xff] }
  0x24   :  { %440 = vmatmul.f32.vlgmr.msra.gmra.mxu0 %v1342_v54 }
  0x25   :  { %525 = vmatpush.msrb.mxu0 %v217_v59 }
  0x27   :  { %526 = vmatpush.msrb.mxu0 %v214_v63 }
  0x29   :  { %527 = vmatpush.msrb.mxu0 %v211_v3 }
  0x74   :  { %v37_v5 = vpop.permute.xlu0 %36 }
  0x75   :  { %vm38_vm0 = vcmp.lt.s32.totalorder %v1085_v4, %v37_v5  ;;  %v297_v5 = vld [vmem:[%s1833_s5 + $0x20] sm:$0xff] }
  0x76   :  { %v975_v7 = vsel %vm38_vm0, 1.0, %v1031_v6  ;;  %v307_v6 = vld [vmem:[%s1833_s5 + $0x70] sm:$0xff]  ;;  %375 = vmatpush.msra.mxu1 %v297_v5 }
  0x77   :  { %v91_v8 = vperm.slane %v975_v7, 6  ;;  %v98_v9 = vperm.slane %v975_v7, 7  ;;  %v63_v10 = vperm.slane %v975_v7, 2  ;;  %v70_v11 = vperm.slane %v975_v7, 3 }
  0x78   :  { %v49_v12 = vperm.slane %v975_v7, 0  ;;  %v56_v13 = vperm.slane %v975_v7, 1  ;;  %v77_v17 = vperm.slane %v975_v7, 4  ;;  %v84_v18 = vperm.slane %v975_v7, 5  ;;  %v185_v7 = vld [vmem:[%s1832_s4 + $0x60] sm:$0xff] }
  0x79   :  { %v1003_v14 = vpack.i.bf16 %v98_v9, %v91_v8  ;;  %v992_v15 = vpack.i.bf16 %v70_v11, %v63_v10  ;;  %v208_v8 = vld [vmem:[%s1832_s4 + $0x118] sm:$0xff]  ;;  %v294_v9 = vld [vmem:[%s1833_s5 + $0x8] sm:$0xff]  ;;  %415 = vmatpush.msra.mxu3 %v185_v7 }
  0x7a   :  { %v986_v16 = vpack.i.bf16 %v56_v13, %v49_v12  ;;  %v997_v19 = vpack.i.bf16 %v84_v18, %v77_v17  ;;  %528 = vmatpush.msrb.mxu0 %v208_v8  ;;  %v304_v11 = vld [vmem:[%s1833_s5 + $0x58] sm:$0xff]  ;;  %v182_v12 = vld [vmem:[%s1832_s4 + $0x48] sm:$0xff]  ;;  %376 = vmatpush.msra.mxu1 %v294_v9  ;;  %v287_v17 = vld [vmem:[%s1832_s4 + $0x390] sm:$0xff] }
  0x7b   :  { %1004 = vperm.xlu2 %1002, %v1003_v14   ;;  %993 = vperm.xlu1 %991, %v992_v15   ;;  %v290_v13 = vld [vmem:[%s1832_s4 + $0x3a8] sm:$0xff]  ;;  %v205_v14 = vld [vmem:[%s1832_s4 + $0x100] sm:$0xff] }
  0x7c   :  { %987 = vperm.xlu0 %985, %v986_v16   ;;  %v301_v15 = vld [vmem:[%s1833_s5 + $0x40] sm:$0xff]  ;;  %v179_v16 = vld [vmem:[%s1832_s4 + $0x30] sm:$0xff]  ;;  %416 = vmatpush.msra.mxu3 %v182_v12  ;;  %v202_v18 = vld [vmem:[%s1832_s4 + $0xe8] sm:$0xff] }
  0x7d   :  { %452 = vmatpush.msrb.mxu1 %v290_v13  ;;  %529 = vmatpush.msrb.mxu0 %v205_v14 }
  0x7e   :  { %417 = vmatpush.msra.mxu3 %v179_v16  ;;  %v178_v16 = vld [vmem:[%s1832_s4 + $0x28] sm:$0xff] }
  0x7f   :  { %453 = vmatpush.msrb.mxu1 %v287_v17  ;;  %530 = vmatpush.msrb.mxu0 %v202_v18 }
  0x80   :  { %418 = vmatpush.msra.mxu3 %v176_v23 }
  0x81   :  { %454 = vmatpush.msrb.mxu1 %v284_v24  ;;  %531 = vmatpush.msrb.mxu0 %v199_v26 }
  0x82   :  { %419 = vmatpush.msra.mxu3 %v173_v28 }
  0x83   :  { %998 = vperm.xlu1 %991, %v997_v19   ;;  %1008 = vset.pattern.permute.xlu2 %v1030_v1  ;;  %v298_v19 = vld [vmem:[%s1833_s5 + $0x28] sm:$0xff] }
  0x84   :  { %1009 = vset.pattern.permute.xlu0 %v1030_v1  ;;  %455 = vmatpush.msrb.mxu1 %v281_v29 }
  0x85   :  { %532 = vmatpush.msrb.mxu0 %v196_v30  ;;  %420 = vmatmul.f32.vlgmr.msra.gmra.mxu3 %v1304_v33 }
  0x86   :  { %456 = vmatpush.msrb.mxu1 %v278_v34 }
  0x87   :  { %533 = vmatpush.msrb.mxu0 %v193_v35 }
  0x88   :  { %457 = vmatpush.msrb.mxu1 %v275_v44 }
  0x89   :  { %534 = vmatpush.msrb.mxu0 %v190_v45 }
  0x8a   :  { %458 = vmatpush.msrb.mxu1 %v272_v52 }
  0x8b   :  { %1010 = vset.pattern.permute.xlu1 %v1030_v1  ;;  %v310_v1 = vld [vmem:[%s1833_s5 + $0x88] sm:$0xff]  ;;  %535 = vmatpush.msrb.mxu0 %v187_v53 }
  0x8c   :  { %391 = vmatpush.msrb.mxu2 %v310_v1  ;;  %459 = vmatpush.msrb.mxu1 %v269_v61 }
  0x8d   :  { %536 = vmatpush.msrb.mxu0 %v184_v62 }
  0x8e   :  { %392 = vmatpush.msrb.mxu2 %v307_v6  ;;  %v181_v6 = vld [vmem:[%s1832_s4 + $0x40] sm:$0xff] }
  0x8f   :  { %537 = vmatpush.msrb.mxu0 %v181_v6  ;;  %v279_v6 = vld [vmem:[%s1832_s4 + $0x350] sm:$0xff] }
  0x90   :  { %393 = vmatpush.msrb.mxu2 %v304_v11  ;;  %v46_v11 = vld [vmem:[%s1834_s1 + $0x28] sm:$0xff] }
  0x91   :  { %538 = vmatpush.msrb.mxu0 %v178_v16  ;;  %v273_v16 = vld [vmem:[%s1832_s4 + $0x320] sm:$0xff] }
  0x92   :  { %394 = vmatpush.msrb.mxu2 %v301_v15 }
  0x94   :  { %395 = vmatpush.msrb.mxu2 %v298_v19 }
  0x96   :  { %396 = vmatpush.msrb.mxu2 %v295_v27 }
  0xd5   :  { %v1005_v10 = vpop.permute.xlu2 %1004 }
  0xd6   :  { %v1007_v20 = vunpack.i.h.bf16 %v1005_v10  ;;  %v1006_v21 = vunpack.i.l.bf16 %v1005_v10  ;;  %v45_v10 = vld [vmem:[%s1834_s1 + $0x20] sm:$0xff] }
  0xd8   :  { %v111_v31 = vmul.f32 %v1006_v21, %v47_v22  ;;  %v112_v32 = vmul.f32 %v1007_v20, %v48_v25  ;;  %v175_v25 = vld [vmem:[%s1832_s4 + $0x10] sm:$0xff] }
  0xd9   :  { %539 = vmatpush.msrb.mxu0 %v175_v25  ;;  %v204_v25 = vld [vmem:[%s1832_s4 + $0xf8] sm:$0xff] }
  0xda   :  { %v156_v46 = vsel %vm113_vm1, %v111_v31, 0.0  ;;  %v163_v47 = vsel %vm113_vm1, %v112_v32, 0.0  ;;  %540 = vmatmul.f32.vlgmr.msrb.gmra.mxu0 %v1304_v33 }
  0xdb   :  { %v157_v57 = vrot.slane %v156_v46, 4  ;;  %v164_v58 = vrot.slane %v163_v47, 4 }
  0xdd   :  { %v158_v17 = vadd.f32 %v157_v57, %v156_v46  ;;  %v165_v18 = vadd.f32 %v164_v58, %v163_v47 }
  0xdf   :  { %v159_v31 = vrot.slane %v158_v17, 2 }
  0xe1   :  { %v160_v44 = vadd.f32 %v159_v31, %v158_v17  ;;  %v213_v17 = vld [vmem:[%s1832_s4 + $0x140] sm:$0xff]  ;;  %v195_v31 = vld [vmem:[%s1832_s4 + $0xb0] sm:$0xff] }
  0xe3   :  { %v161_v58 = vrot.slane %v160_v44, 1 }
  0xed   :  { %v994_v36 = vpop.permute.xlu1 %993 }
  0xee   :  { %v996_v40 = vunpack.i.h.bf16 %v994_v36  ;;  %v995_v41 = vunpack.i.l.bf16 %v994_v36  ;;  %v988_v42 = vpop.permute.xlu0 %987  ;;  %v166_v36 = vrot.slane %v165_v18, 2 }
  0xef   :  { %v990_v48 = vunpack.i.h.bf16 %v988_v42  ;;  %v989_v49 = vunpack.i.l.bf16 %v988_v42 }
  0xf0   :  { %v107_v50 = vmul.f32 %v995_v41, %v43_v37  ;;  %v108_v51 = vmul.f32 %v996_v40, %v44_v38 }
  0xf1   :  { %v105_v55 = vmul.f32 %v989_v49, %v41_v39  ;;  %v106_v56 = vmul.f32 %v990_v48, %v42_v43  ;;  %v291_v48 = vld [vmem:[%s1832_s4 + $0x3b0] sm:$0xff] }
  0xf2   :  { %v128_v59 = vsel %vm113_vm1, %v107_v50, 0.0  ;;  %v135_v60 = vsel %vm113_vm1, %v108_v51, 0.0  ;;  %v167_v50 = vadd.f32 %v166_v36, %v165_v18  ;;  %512 = vmatpush.msrb.mxu3 %v291_v48  ;;  %v261_v18 = vld [vmem:[%s1832_s4 + $0x2c0] sm:$0xff] }
  0xf3   :  { %v129_v63 = vrot.slane %v128_v59, 4  ;;  %v136_v0 = vrot.slane %v135_v60, 4  ;;  %v114_v1 = vsel %vm113_vm1, %v105_v55, 0.0  ;;  %v121_v2 = vsel %vm113_vm1, %v106_v56, 0.0  ;;  %v288_v55 = vld [vmem:[%s1832_s4 + $0x398] sm:$0xff]  ;;  %v189_v36 = vld [vmem:[%s1832_s4 + $0x80] sm:$0xff] }
  0xf4   :  { %v115_v3 = vrot.slane %v114_v1, 4  ;;  %v122_v5 = vrot.slane %v121_v2, 4  ;;  %513 = vmatpush.msrb.mxu3 %v288_v55  ;;  %v168_v62 = vrot.slane %v167_v50, 1  ;;  %v177_v48 = vld [vmem:[%s1832_s4 + $0x20] sm:$0xff]  ;;  %v268_v55 = vld [vmem:[%s1832_s4 + $0x2f8] sm:$0xff] }
  0xf5   :  { %v130_v7 = vadd.f32 %v129_v63, %v128_v59  ;;  %v137_v8 = vadd.f32 %v136_v0, %v135_v60  ;;  %v999_v9 = vpop.permute.xlu1 %998  ;;  %v285_v60 = vld [vmem:[%s1832_s4 + $0x380] sm:$0xff] }
  0xf6   :  { %v116_v12 = vadd.f32 %v115_v3, %v114_v1  ;;  %v123_v13 = vadd.f32 %v122_v5, %v121_v2  ;;  %v1001_v14 = vunpack.i.h.bf16 %v999_v9  ;;  %v1000_v15 = vunpack.i.l.bf16 %v999_v9  ;;  %514 = vmatpush.msrb.mxu3 %v285_v60  ;;  %v282_v1 = vld [vmem:[%s1832_s4 + $0x368] sm:$0xff] }
  0xf7   :  { %v131_v19 = vrot.slane %v130_v7, 2  ;;  %v138_v20 = vrot.slane %v137_v8, 2  ;;  %v162_v3 = vadd.f32 %v161_v58, %v160_v44  ;;  %v286_v44 = vld [vmem:[%s1832_s4 + $0x388] sm:$0xff]  ;;  %v271_v58 = vld [vmem:[%s1832_s4 + $0x310] sm:$0xff] }
  0xf8   :  { %v117_v21 = vrot.slane %v116_v12, 2  ;;  %v124_v22 = vrot.slane %v123_v13, 2  ;;  %v109_v23 = vmul.f32 %v1000_v15, %v45_v10  ;;  %v110_v24 = vmul.f32 %v1001_v14, %v46_v11  ;;  %515 = vmatpush.msrb.mxu3 %v282_v1  ;;  %v219_v10 = vld [vmem:[%s1832_s4 + $0x170] sm:$0xff]  ;;  %v216_v14 = vld [vmem:[%s1832_s4 + $0x158] sm:$0xff]  ;;  %v262_v60 = vld [vmem:[%s1832_s4 + $0x2c8] sm:$0xff] }
  0xf9   :  { %v132_v26 = vadd.f32 %v131_v19, %v130_v7  ;;  %v139_v37 = vadd.f32 %v138_v20, %v137_v8  ;;  %v169_v7 = vadd.f32 %v168_v62, %v167_v50  ;;  %v267_v11 = vld [vmem:[%s1832_s4 + $0x2f0] sm:$0xff]  ;;  %v264_v15 = vld [vmem:[%s1832_s4 + $0x2d8] sm:$0xff]  ;;  %v270_v19 = vld [vmem:[%s1832_s4 + $0x308] sm:$0xff] }
  0xfa   :  { %v118_v27 = vadd.f32 %v117_v21, %v116_v12  ;;  %v125_v28 = vadd.f32 %v124_v22, %v123_v13  ;;  %v142_v29 = vsel %vm113_vm1, %v109_v23, 0.0  ;;  %v149_v30 = vsel %vm113_vm1, %v110_v24, 0.0  ;;  %516 = vmatpush.msrb.mxu3 %v279_v6  ;;  %v276_v12 = vld [vmem:[%s1832_s4 + $0x338] sm:$0xff]  ;;  %v210_v20 = vld [vmem:[%s1832_s4 + $0x128] sm:$0xff]  ;;  %v1433_v22 = vld [vmem:[%s1835_s0 + $0x10] sm:$0xff] }
  0xfb   :  { %v133_v32 = vrot.slane %v132_v26, 1  ;;  %v143_v34 = vrot.slane %v142_v29, 4  ;;  %v150_v35 = vrot.slane %v149_v30, 4  ;;  %v140_v49 = vrot.slane %v139_v37, 1  ;;  %v258_v21 = vld [vmem:[%s1832_s4 + $0x2a8] sm:$0xff]  ;;  %v207_v23 = vld [vmem:[%s1832_s4 + $0x110] sm:$0xff] }
  0xfc   :  { %v119_v38 = vrot.slane %v118_v27, 1  ;;  %v126_v39 = vrot.slane %v125_v28, 1  ;;  %517 = vmatpush.msrb.mxu3 %v276_v12  ;;  %v255_v24 = vld [vmem:[%s1832_s4 + $0x290] sm:$0xff]  ;;  %v280_v50 = vld [vmem:[%s1832_s4 + $0x358] sm:$0xff]  ;;  %v607_v6 = vld [vmem:[%s1836_s7 + $0x48] sm:$0xff] }
  0xfd   :  { %v144_v40 = vadd.f32 %v143_v34, %v142_v29  ;;  %v151_v41 = vadd.f32 %v150_v35, %v149_v30  ;;  %v134_v45 = vadd.f32 %v133_v32, %v132_v26  ;;  %v141_v61 = vadd.f32 %v140_v49, %v139_v37  ;;  %v252_v26 = vld [vmem:[%s1832_s4 + $0x278] sm:$0xff]  ;;  %v198_v29 = vld [vmem:[%s1832_s4 + $0xc8] sm:$0xff]  ;;  %v243_v32 = vld [vmem:[%s1832_s4 + $0x230] sm:$0xff] }
  0xfe   :  { %v120_v42 = vadd.f32 %v119_v38, %v118_v27  ;;  %v127_v43 = vadd.f32 %v126_v39, %v125_v28  ;;  %518 = vmatpush.msrb.mxu3 %v273_v16  ;;  %v201_v27 = vld [vmem:[%s1832_s4 + $0xe0] sm:$0xff]  ;;  %v246_v30 = vld [vmem:[%s1832_s4 + $0x248] sm:$0xff]  ;;  %v192_v34 = vld [vmem:[%s1832_s4 + $0x98] sm:$0xff] }
  0xff   :  { %v145_v46 = vrot.slane %v144_v40, 2  ;;  %v152_v47 = vrot.slane %v151_v41, 2  ;;  %v249_v28 = vld [vmem:[%s1832_s4 + $0x260] sm:$0xff]  ;;  %v240_v35 = vld [vmem:[%s1832_s4 + $0x218] sm:$0xff]  ;;  %v186_v39 = vld [vmem:[%s1832_s4 + $0x68] sm:$0xff] }
 0x100   :  { %v326_v51 = vsel %vm325_vm2, %v127_v43, %v120_v42  ;;  %519 = vmatpush.msrb.mxu3 %v270_v19  ;;  %v237_v37 = vld [vmem:[%s1832_s4 + $0x200] sm:$0xff]  ;;  %v292_v38 = vld [vmem:[%s1832_s4 + $0x3b8] sm:$0xff]  ;;  %v183_v42 = vld [vmem:[%s1832_s4 + $0x50] sm:$0xff] }
 0x101   :  { %v146_v52 = vadd.f32 %v145_v46, %v144_v40  ;;  %v153_v53 = vadd.f32 %v152_v47, %v151_v41  ;;  %v328_v59 = vsel %vm327_vm3, %v134_v45, %v326_v51  ;;  %980 = vmatmul.msk.f32.vlgmr.msrb.gmra.mxu3 %vm113_vm1, %v1433_v22  ;;  %v234_v40 = vld [vmem:[%s1832_s4 + $0x1e8] sm:$0xff]  ;;  %v289_v41 = vld [vmem:[%s1832_s4 + $0x3a0] sm:$0xff]  ;;  %v231_v43 = vld [vmem:[%s1832_s4 + $0x1d0] sm:$0xff] }
 0x102   :  { %v330_v2 = vsel %vm329_vm4, %v141_v61, %v328_v59  ;;  %572 = vmatpush.msra.mxu3 %v292_v38  ;;  %v180_v45 = vld [vmem:[%s1832_s4 + $0x38] sm:$0xff]  ;;  %v283_v47 = vld [vmem:[%s1832_s4 + $0x370] sm:$0xff]  ;;  %v225_v49 = vld [vmem:[%s1832_s4 + $0x1a0] sm:$0xff] }
 0x103   :  { %v147_v56 = vrot.slane %v146_v52, 1  ;;  %v154_v57 = vrot.slane %v153_v53, 1  ;;  %v228_v46 = vld [vmem:[%s1832_s4 + $0x1b8] sm:$0xff]  ;;  %v174_v51 = vld [vmem:[%s1832_s4 + $0x8] sm:$0xff]  ;;  %v259_v62 = vld [vmem:[%s1832_s4 + $0x2b0] sm:$0xff] }
 0x104   :  { %573 = vmatpush.msra.mxu3 %v289_v41  ;;  %v613_v59 = vld [vmem:[%s1836_s7 + $0x78] sm:$0xff]  ;;  %v611_v61 = vld [vmem:[%s1836_s7 + $0x68] sm:$0xff]  ;;  %v606_v16 = vld [vmem:[%s1836_s7 + $0x40] sm:$0xff]  ;;  %v441_v41 = vpop.f32.mrf.mxu0 }
 0x105   :  { %v148_v63 = vadd.f32 %v147_v56, %v146_v52  ;;  %v155_v0 = vadd.f32 %v154_v57, %v153_v53  ;;  %v222_v52 = vld [vmem:[%s1832_s4 + $0x188] sm:$0xff]  ;;  %v277_v53 = vld [vmem:[%s1832_s4 + $0x340] sm:$0xff]  ;;  %v609_v1 = vld [vmem:[%s1836_s7 + $0x58] sm:$0xff] }
 0x106   :  { %574 = vmatpush.msra.mxu3 %v286_v44  ;;  %v274_v56 = vld [vmem:[%s1832_s4 + $0x328] sm:$0xff]  ;;  %v265_v57 = vld [vmem:[%s1832_s4 + $0x2e0] sm:$0xff]  ;;  %v232_v12 = vld [vmem:[%s1832_s4 + $0x1d8] sm:$0xff] }
 0x107   :  { %v332_v5 = vsel %vm331_vm5, %v148_v63, %v330_v2  ;;  %v610_v63 = vld [vmem:[%s1836_s7 + $0x60] sm:$0xff]  ;;  %v603_v19 = vld [vmem:[%s1836_s7 + $0x28] sm:$0xff] }
 0x108   :  { %v334_v8 = vsel %vm333_vm6, %v155_v0, %v332_v5  ;;  %575 = vmatpush.msra.mxu3 %v283_v47  ;;  %v256_v0 = vld [vmem:[%s1832_s4 + $0x298] sm:$0xff]  ;;  %v253_v2 = vld [vmem:[%s1832_s4 + $0x280] sm:$0xff]  ;;  %v250_v5 = vld [vmem:[%s1832_s4 + $0x268] sm:$0xff] }
 0x109   :  { %v336_v9 = vsel %vm335_vm7, %v162_v3, %v334_v8  ;;  %v608_v3 = vld [vmem:[%s1836_s7 + $0x50] sm:$0xff]  ;;  %v244_v8 = vld [vmem:[%s1832_s4 + $0x238] sm:$0xff]  ;;  %v1670_v38 = vld [vmem:[%s1838_s6] sm:$0x7] }
 0x10a   :  { %v338_v13 = vsel %vm337_vm8, %v169_v7, %v336_v9  ;;  %576 = vmatpush.msra.mxu3 %v280_v50  ;;  %v247_v7 = vld [vmem:[%s1832_s4 + $0x250] sm:$0xff]  ;;  %v241_v9 = vld [vmem:[%s1832_s4 + $0x220] sm:$0xff]  ;;  %v615_v50 = vld [vmem:[%s1836_s7 + $0x88] sm:$0xff] }
 0x10b   :  { %976 = vmatmul.msk.f32.vlgmr.msra.gmra.mxu2 %vm113_vm1, %v338_v13  ;;  %977 = vmatmul.msk.f32.vlgmr.msra.gmra.mxu1 %vm113_vm1, %v338_v13 }
 0x10c   :  { %464 = vmatpush.msra.mxu2 %v219_v10  ;;  %484 = vmatpush.msra.mxu1 %v267_v11  ;;  %v238_v10 = vld [vmem:[%s1832_s4 + $0x208] sm:$0xff]  ;;  %v235_v11 = vld [vmem:[%s1832_s4 + $0x1f0] sm:$0xff] }
 0x10d   :  { %577 = vmatpush.msra.mxu3 %v277_v53  ;;  %v614_v53 = vld [vmem:[%s1836_s7 + $0x80] sm:$0xff] }
 0x10e   :  { %465 = vmatpush.msra.mxu2 %v216_v14  ;;  %485 = vmatpush.msra.mxu1 %v264_v15  ;;  %v226_v14 = vld [vmem:[%s1832_s4 + $0x1a8] sm:$0xff]  ;;  %v223_v15 = vld [vmem:[%s1832_s4 + $0x190] sm:$0xff] }
 0x10f   :  { %578 = vmatpush.msra.mxu3 %v274_v56  ;;  %v643_v56 = vld [vmem:[%s1836_s7 + $0x168] sm:$0xff] }
 0x110   :  { %466 = vmatpush.msra.mxu2 %v213_v17  ;;  %486 = vmatpush.msra.mxu1 %v261_v18  ;;  %v605_v17 = vld [vmem:[%s1836_s7 + $0x38] sm:$0xff]  ;;  %v604_v18 = vld [vmem:[%s1836_s7 + $0x30] sm:$0xff] }
 0x111   :  { %579 = vmatpush.msra.mxu3 %v271_v58  ;;  %v641_v58 = vld [vmem:[%s1836_s7 + $0x158] sm:$0xff] }
 0x112   :  { %467 = vmatpush.msra.mxu2 %v210_v20  ;;  %487 = vmatpush.msra.mxu1 %v258_v21  ;;  %v601_v20 = vld [vmem:[%s1836_s7 + $0x18] sm:$0xff]  ;;  %v600_v21 = vld [vmem:[%s1836_s7 + $0x10] sm:$0xff] }
 0x113   :  { %978 = vmatmul.msk.f32.vlgmr.msrb.gmra.mxu2 %vm113_vm1, %v338_v13  ;;  %979 = vmatmul.msk.f32.vlgmr.msrb.gmra.mxu1 %vm113_vm1, %v1433_v22  ;;  %v229_v13 = vld [vmem:[%s1832_s4 + $0x1c0] sm:$0xff] }
 0x114   :  { %468 = vmatpush.msra.mxu2 %v207_v23  ;;  %488 = vmatpush.msra.mxu1 %v255_v24  ;;  %v598_v23 = vld [vmem:[%s1836_s7] sm:$0xff]  ;;  %v629_v24 = vld [vmem:[%s1836_s7 + $0xf8] sm:$0xff] }
 0x115   :  { %981 = vmatmul.msk.f32.vlgmr.msra.gmra.mxu3 %vm113_vm1, %v1433_v22  ;;  %v599_v22 = vld [vmem:[%s1836_s7 + $0x8] sm:$0xff] }
 0x116   :  { %469 = vmatpush.msra.mxu2 %v204_v25  ;;  %489 = vmatpush.msra.mxu1 %v252_v26  ;;  %v628_v25 = vld [vmem:[%s1836_s7 + $0xf0] sm:$0xff]  ;;  %v627_v26 = vld [vmem:[%s1836_s7 + $0xe8] sm:$0xff] }
 0x117   :  { %670 = vmatpush.msrb.mxu3 %v629_v24  ;;  %v1011_v24 = vld [vmem:[%s1837_s8] ss:$0 sm:$0xff] }
 0x118   :  { %470 = vmatpush.msra.mxu2 %v201_v27  ;;  %490 = vmatpush.msra.mxu1 %v249_v28  ;;  %v626_v27 = vld [vmem:[%s1836_s7 + $0xe0] sm:$0xff]  ;;  %v625_v28 = vld [vmem:[%s1836_s7 + $0xd8] sm:$0xff] }
 0x119   :  { %671 = vmatpush.msrb.mxu3 %v628_v25 }
 0x11a   :  { %471 = vmatpush.msra.mxu2 %v198_v29  ;;  %491 = vmatpush.msra.mxu1 %v246_v30  ;;  %v624_v29 = vld [vmem:[%s1836_s7 + $0xd0] sm:$0xff]  ;;  %v623_v30 = vld [vmem:[%s1836_s7 + $0xc8] sm:$0xff] }
 0x11b   :  { %672 = vmatpush.msrb.mxu3 %v627_v26 }
 0x11c   :  { %472 = vmatpush.msra.mxu2 %v195_v31  ;;  %492 = vmatpush.msra.mxu1 %v243_v32  ;;  %v622_v31 = vld [vmem:[%s1836_s7 + $0xc0] sm:$0xff]  ;;  %v621_v32 = vld [vmem:[%s1836_s7 + $0xb8] sm:$0xff] }
 0x11d   :  { %673 = vmatpush.msrb.mxu3 %v626_v27 }
 0x11e   :  { %473 = vmatpush.msra.mxu2 %v192_v34  ;;  %493 = vmatpush.msra.mxu1 %v240_v35  ;;  %v620_v35 = vld [vmem:[%s1836_s7 + $0xb0] sm:$0xff] }
 0x11f   :  { %674 = vmatpush.msrb.mxu3 %v625_v28 }
 0x120   :  { %474 = vmatpush.msra.mxu2 %v189_v36  ;;  %494 = vmatpush.msra.mxu1 %v237_v37  ;;  %v421_v36 = vpop.f32.mrf.mxu3 }
 0x121   :  { %675 = vmatpush.msrb.mxu3 %v624_v29 }
 0x122   :  { %475 = vmatpush.msra.mxu2 %v186_v39  ;;  %495 = vmatpush.msra.mxu1 %v234_v40  ;;  %v619_v39 = vld [vmem:[%s1836_s7 + $0xa8] sm:$0xff] }
 0x123   :  { %676 = vmatpush.msrb.mxu3 %v623_v30 }
 0x124   :  { %476 = vmatpush.msra.mxu2 %v183_v42  ;;  %496 = vmatpush.msra.mxu1 %v231_v43  ;;  %v618_v43 = vld [vmem:[%s1836_s7 + $0xa0] sm:$0xff] }
 0x125   :  { %677 = vmatpush.msrb.mxu3 %v622_v31 }
 0x126   :  { %477 = vmatpush.msra.mxu2 %v180_v45  ;;  %497 = vmatpush.msra.mxu1 %v228_v46  ;;  %v586_v45 = vperm.slane %v1670_v38, 0  ;;  %v617_v46 = vld [vmem:[%s1836_s7 + $0x98] sm:$0xff] }
 0x127   :  { %678 = vmatpush.msrb.mxu3 %v621_v32  ;;  %v719_v32 = vld [vmem:[%s1839_s3] sm:$0x3f] }
 0x128   :  { %478 = vmatpush.msra.mxu2 %v177_v48  ;;  %498 = vmatpush.msra.mxu1 %v225_v49  ;;  %v616_v48 = vld [vmem:[%s1836_s7 + $0x90] sm:$0xff] }
 0x129   :  { %679 = vmatpush.msrb.mxu3 %v620_v35 }
 0x12a   :  { %479 = vmatpush.msra.mxu2 %v174_v51  ;;  %499 = vmatpush.msra.mxu1 %v222_v52  ;;  %v645_v52 = vld [vmem:[%s1836_s7 + $0x178] sm:$0xff] }
 0x12b   :  { %480 = vmatmul.f32.vlgmr.msra.gmra.mxu2 %v1304_v33  ;;  %500 = vmatmul.f32.vlgmr.msra.gmra.mxu1 %v1342_v54  ;;  %v612_v33 = vld [vmem:[%s1836_s7 + $0x70] sm:$0xff] }
 0x12c   :  { %544 = vmatpush.msrb.mxu2 %v268_v55  ;;  %650 = vmatpush.msrb.mxu1 %v613_v59  ;;  %v644_v55 = vld [vmem:[%s1836_s7 + $0x170] sm:$0xff] }
 0x12d   :  { %680 = vmatpush.msrb.mxu3 %v619_v39  ;;  %690 = vmatpush.msra.mxu0 %v645_v52  ;;  %v640_v59 = vld [vmem:[%s1836_s7 + $0x150] sm:$0xff]  ;;  %v720_v39 = vld [vmem:[%s1839_s3 + $0x8] sm:$0x3f] }
 0x12e   :  { %545 = vmatpush.msrb.mxu2 %v265_v57  ;;  %651 = vmatpush.msrb.mxu1 %v612_v33  ;;  %v642_v57 = vld [vmem:[%s1836_s7 + $0x160] sm:$0xff]  ;;  %v639_v33 = vld [vmem:[%s1836_s7 + $0x148] sm:$0xff] }
 0x12f   :  { %681 = vmatpush.msrb.mxu3 %v618_v43  ;;  %691 = vmatpush.msra.mxu0 %v644_v55  ;;  %v726_v55 = vld [vmem:[%s1839_s3 + $0x38] sm:$0x3f] }
 0x130   :  { %546 = vmatpush.msrb.mxu2 %v262_v60  ;;  %652 = vmatpush.msrb.mxu1 %v611_v61  ;;  %v638_v60 = vld [vmem:[%s1836_s7 + $0x140] sm:$0xff]  ;;  %v637_v61 = vld [vmem:[%s1836_s7 + $0x138] sm:$0xff] }
 0x131   :  { %682 = vmatpush.msrb.mxu3 %v617_v46  ;;  %692 = vmatpush.msra.mxu0 %v643_v56  ;;  %v724_v56 = vld [vmem:[%s1839_s3 + $0x28] sm:$0x3f] }
 0x132   :  { %547 = vmatpush.msrb.mxu2 %v259_v62  ;;  %653 = vmatpush.msrb.mxu1 %v610_v63  ;;  %v636_v63 = vld [vmem:[%s1836_s7 + $0x130] sm:$0xff] }
 0x133   :  { %683 = vmatpush.msrb.mxu3 %v616_v48  ;;  %693 = vmatpush.msra.mxu0 %v642_v57 }
 0x134   :  { %548 = vmatpush.msrb.mxu2 %v256_v0  ;;  %654 = vmatpush.msrb.mxu1 %v609_v1  ;;  %v635_v0 = vld [vmem:[%s1836_s7 + $0x128] sm:$0xff]  ;;  %v634_v1 = vld [vmem:[%s1836_s7 + $0x120] sm:$0xff] }
 0x135   :  { %684 = vmatpush.msrb.mxu3 %v615_v50  ;;  %694 = vmatpush.msra.mxu0 %v641_v58 }
 0x136   :  { %549 = vmatpush.msrb.mxu2 %v253_v2  ;;  %655 = vmatpush.msrb.mxu1 %v608_v3 }
 0x137   :  { %685 = vmatpush.msrb.mxu3 %v614_v53  ;;  %695 = vmatpush.msra.mxu0 %v640_v59 }
 0x138   :  { %550 = vmatpush.msrb.mxu2 %v250_v5  ;;  %656 = vmatpush.msrb.mxu1 %v607_v6  ;;  %v633_v6 = vld [vmem:[%s1836_s7 + $0x118] sm:$0xff] }
 0x139   :  { %696 = vmatpush.msra.mxu0 %v639_v33 }
 0x13a   :  { %551 = vmatpush.msrb.mxu2 %v247_v7  ;;  %657 = vmatpush.msrb.mxu1 %v606_v16 }
 0x13b   :  { %697 = vmatpush.msra.mxu0 %v638_v60 }
 0x13c   :  { %552 = vmatpush.msrb.mxu2 %v244_v8  ;;  %658 = vmatpush.msrb.mxu1 %v605_v17 }
 0x13d   :  { %698 = vmatpush.msra.mxu0 %v637_v61 }
 0x13e   :  { %553 = vmatpush.msrb.mxu2 %v241_v9  ;;  %659 = vmatpush.msrb.mxu1 %v604_v18  ;;  %v587_v9 = vperm.slane %v1670_v38, 1 }
 0x13f   :  { %699 = vmatpush.msra.mxu0 %v636_v63 }
 0x140   :  { %554 = vmatpush.msrb.mxu2 %v238_v10  ;;  %660 = vmatpush.msrb.mxu1 %v603_v19  ;;  %v632_v10 = vld [vmem:[%s1836_s7 + $0x110] sm:$0xff] }
 0x141   :  { %700 = vmatpush.msra.mxu0 %v635_v0 }
 0x142   :  { %555 = vmatpush.msrb.mxu2 %v235_v11 }
 0x143   :  { %701 = vmatpush.msra.mxu0 %v634_v1 }
 0x144   :  { %556 = vmatpush.msrb.mxu2 %v232_v12  ;;  %v631_v12 = vld [vmem:[%s1836_s7 + $0x108] sm:$0xff] }
 0x145   :  { %702 = vmatpush.msra.mxu0 %v633_v6  ;;  %v725_v6 = vld [vmem:[%s1839_s3 + $0x30] sm:$0x3f] }
 0x146   :  { %557 = vmatpush.msrb.mxu2 %v229_v13 }
 0x147   :  { %703 = vmatpush.msra.mxu0 %v632_v10 }
 0x148   :  { %558 = vmatpush.msrb.mxu2 %v226_v14  ;;  %v630_v14 = vld [vmem:[%s1836_s7 + $0x100] sm:$0xff] }
 0x149   :  { %704 = vmatpush.msra.mxu0 %v631_v12 }
 0x14a   :  { %559 = vmatpush.msrb.mxu2 %v223_v15 }
 0x14b   :  { %560 = vmatmul.f32.vlgmr.msrb.gmra.mxu2 %v1342_v54  ;;  %v602_v54 = vld [vmem:[%s1836_s7 + $0x20] sm:$0xff]  ;;  %705 = vmatpush.msra.mxu0 %v630_v14 }
 0x14c   :  { %661 = vmatpush.msrb.mxu1 %v602_v54 }
 0x14e   :  { %662 = vmatpush.msrb.mxu1 %v601_v20  ;;  %v588_v20 = vperm.slane %v1670_v38, 2  ;;  %v721_v38 = vld [vmem:[%s1839_s3 + $0x10] sm:$0x3f] }
 0x150   :  { %663 = vmatpush.msrb.mxu1 %v600_v21 }
 0x152   :  { %664 = vmatpush.msrb.mxu1 %v599_v22 }
 0x154   :  { %665 = vmatpush.msrb.mxu1 %v598_v23 }
 0x157   :  { %v541_v16 = vpop.f32.mrf.mxu0 }
 0x184   :  { %v521_v7 = vpop.f32.mrf.mxu3 }
 0x188   :  { %v378_v34 = vpop.f32.mrf.mxu1 }
 0x18e   :  { %v358_v37 = vpop.f32.mrf.mxu2 }
 0x18f   :  { %v422_v40 = vadd.f32 %v421_v36, %v358_v37 }
 0x190   :  { %v461_v42 = vpop.f32.mrf.mxu1 }
 0x191   :  { %v442_v44 = vadd.f32 %v441_v41, %v422_v40 }
 0x193   :  { %v462_v47 = vadd.f32 %v461_v42, %v442_v44 }
 0x195   :  { %v592_v49 = vadd.f32 %v586_v45, %v462_v47 }
 0x196   :  { %v398_v62 = vpop.f32.mrf.mxu2 }
 0x197   :  { %v595_v51 = vmax.f32 %v592_v49, 0.0  ;;  %v542_v17 = vadd.f32 %v541_v16, %v398_v62  ;;  %v722_v49 = vld [vmem:[%s1839_s3 + $0x18] sm:$0x3f]  ;;  %v723_v62 = vld [vmem:[%s1839_s3 + $0x20] sm:$0x3f] }
 0x198   :  { %v581_v19 = vpop.f32.mrf.mxu3 }
 0x199   :  { %666 = vmatmul.f32.vlgmr.msrb.gmra.mxu1 %v595_v51 }
 0x1a8   :  { %v501_v3 = vpop.f32.mrf.mxu1 }
 0x1ae   :  { %v481_v2 = vpop.f32.mrf.mxu2 }
 0x1af   :  { %v482_v5 = vadd.f32 %v481_v2, %v378_v34 }
 0x1b1   :  { %v502_v8 = vadd.f32 %v501_v3, %v482_v5 }
 0x1b3   :  { %v522_v11 = vadd.f32 %v521_v7, %v502_v8 }
 0x1b5   :  { %v593_v13 = vadd.f32 %v587_v9, %v522_v11 }
 0x1b7   :  { %v596_v15 = vmax.f32 %v593_v13, 0.0 }
 0x1b9   :  { %686 = vmatmul.f32.vlgmr.msrb.gmra.mxu3 %v596_v15 }
 0x1ce   :  { %v561_v18 = vpop.f32.mrf.mxu2 }
 0x1cf   :  { %v562_v54 = vadd.f32 %v561_v18, %v542_v17 }
 0x1d1   :  { %v582_v21 = vadd.f32 %v581_v19, %v562_v54 }
 0x1d3   :  { %v594_v22 = vadd.f32 %v588_v20, %v582_v21 }
 0x1d5   :  { %v597_v23 = vmax.f32 %v594_v22, 0.0 }
 0x1d7   :  { %706 = vmatmul.f32.vlgmr.msra.gmra.mxu0 %v597_v23 }
 0x216   :  { %v667_v25 = vpop.f32.mrf.mxu1 }
 0x217   :  { %v668_v27 = vadd.f32 %v1011_v24, %v667_v25 }
 0x23c   :  { %v687_v26 = vpop.f32.mrf.mxu3 }
 0x23d   :  { %v688_v28 = vadd.f32 %v687_v26, %v668_v27 }
 0x254   :  { %v707_v29 = vpop.f32.mrf.mxu0 }
 0x255   :  { %v708_v30 = vadd.f32 %v707_v29, %v688_v28 }
 0x257   :  { %v710_v31 = vmax.f32 %v708_v30, 0.0 }
 0x259   :  { %v727_v34 = vperm.slane %v710_v31, 0  ;;  %v713_v35 = vrot.slane %v710_v31, 2  ;;  %v712_v36 = vrot.slane %v710_v31, 1  ;;  %v714_v37 = vrot.slane %v710_v31, 3 }
 0x25a   :  { %v718_v40 = vrot.slane %v710_v31, 7  ;;  %v716_v44 = vrot.slane %v710_v31, 5  ;;  %v715_v58 = vrot.slane %v710_v31, 4  ;;  %v717_v2 = vrot.slane %v710_v31, 6 }
 0x25b   :  { %v743_v41 = vmul.f32 %v727_v34, %v719_v32  ;;  %v729_v42 = vperm.slane %v713_v35, 0  ;;  %v728_v43 = vperm.slane %v712_v36, 0  ;;  %v730_v48 = vperm.slane %v714_v37, 0 }
 0x25c   :  { %v734_v52 = vperm.slane %v718_v40, 0  ;;  %v732_v53 = vperm.slane %v716_v44, 0  ;;  %v731_v61 = vperm.slane %v715_v58, 0  ;;  %v733_v5 = vperm.slane %v717_v2, 0 }
 0x25d   :  { %v752_v45 = vsel %vm751_vm9, %v743_v41, 0.0  ;;  %v745_v46 = vmul.f32 %v729_v42, %v721_v38  ;;  %v744_v47 = vmul.f32 %v728_v43, %v720_v39  ;;  %v746_v57 = vmul.f32 %v730_v48, %v722_v49 }
 0x25e   :  { %753 = vadd.xlane.f32.xlu2 %v752_v45  ;;  %v750_v59 = vmul.f32 %v734_v52, %v726_v55  ;;  %v748_v33 = vmul.f32 %v732_v53, %v724_v56  ;;  %v747_v1 = vmul.f32 %v731_v61, %v723_v62  ;;  %v749_v7 = vmul.f32 %v733_v5, %v725_v6 }
 0x25f   :  { %v758_v50 = vsel %vm751_vm9, %v745_v46, 0.0  ;;  %v755_v51 = vsel %vm751_vm9, %v744_v47, 0.0  ;;  %v761_v60 = vsel %vm751_vm9, %v746_v57, 0.0 }
 0x260   :  { %759 = vadd.xlane.f32.xlu0 %v758_v50  ;;  %756 = vadd.xlane.f32.xlu1 %v755_v51  ;;  %v773_v63 = vsel %vm751_vm9, %v750_v59, 0.0  ;;  %v767_v0 = vsel %vm751_vm9, %v748_v33, 0.0  ;;  %v764_v3 = vsel %vm751_vm9, %v747_v1, 0.0  ;;  %v770_v8 = vsel %vm751_vm9, %v749_v7, 0.0 }
 0x266   :  { %762 = vadd.xlane.f32.xlu2 %v761_v60 }
 0x268   :  { %774 = vadd.xlane.f32.xlu0 %v773_v63  ;;  %768 = vadd.xlane.f32.xlu1 %v767_v0 }
 0x26e   :  { %765 = vadd.xlane.f32.xlu2 %v764_v3 }
 0x276   :  { %771 = vadd.xlane.f32.xlu2 %v770_v8 }
 0x2d1   :  { %v754_v9 = vpop.xlane.xlu2 %753 }
 0x2d2   :  { %v784_v14 = vperm.slane %v754_v9, %v1085_v4 }
 0x2d3   :  { %v757_v11 = vpop.xlane.xlu1 %756  ;;  %v760_v12 = vpop.xlane.xlu0 %759 }
 0x2d4   :  { %v785_v13 = vperm.slane %v757_v11, %v1085_v4  ;;  %v786_v16 = vperm.slane %v760_v12, %v1085_v4 }
 0x2d6   :  { %v792_v17 = vsel %vm325_vm2, %v785_v13, %v784_v14 }
 0x2d7   :  { %v793_v54 = vsel %vm327_vm3, %v786_v16, %v792_v17 }
 0x2d9   :  { %v763_v10 = vpop.xlane.xlu2 %762 }
 0x2da   :  { %v787_v18 = vperm.slane %v763_v10, %v1085_v4 }
 0x2db   :  { %v769_v20 = vpop.xlane.xlu1 %768  ;;  %v775_v22 = vpop.xlane.xlu0 %774 }
 0x2dc   :  { %v794_v21 = vsel %vm329_vm4, %v787_v18, %v793_v54  ;;  %v789_v24 = vperm.slane %v769_v20, %v1085_v4  ;;  %v791_v27 = vperm.slane %v775_v22, %v1085_v4 }
 0x2e1   :  { %v766_v15 = vpop.xlane.xlu2 %765 }
 0x2e2   :  { %v788_v19 = vperm.slane %v766_v15, %v1085_v4 }
 0x2e4   :  { %v795_v23 = vsel %vm331_vm5, %v788_v19, %v794_v21 }
 0x2e5   :  { %v796_v28 = vsel %vm333_vm6, %v789_v24, %v795_v23 }
 0x2e9   :  { %v772_v25 = vpop.xlane.xlu2 %771 }
 0x2ea   :  { %v790_v26 = vperm.slane %v772_v25, %v1085_v4 }
 0x2ec   :  { %v797_v29 = vsel %vm335_vm7, %v790_v26, %v796_v28 }
 0x2ed   :  { %v798_v30 = vsel %vm337_vm8, %v791_v27, %v797_v29 }
 0x2ee   :  { %v801_v31 = vsel %vm800_vm10, %v798_v30, -inf }
 0x2ef   :  { %802 = vmax.xlane.f32.xlu1 %v801_v31 }
 0x362   :  { %v803_v32 = vpop.xlane.xlu1 %802 }
 0x363   :  { %v807_v34 = vperm.slane %v803_v32, 2  ;;  %v806_v35 = vperm.slane %v803_v32, 1  ;;  %v805_v36 = vperm.slane %v803_v32, 0  ;;  %v809_v40 = vperm.slane %v803_v32, 4 }
 0x364   :  { %v808_v41 = vperm.slane %v803_v32, 3  ;;  %v811_v48 = vperm.slane %v803_v32, 6  ;;  %v810_v51 = vperm.slane %v803_v32, 5  ;;  %v812_v33 = vperm.slane %v803_v32, 7 }
 0x365   :  { %v823_v37 = vsub.f32 %v760_v12, %v807_v34  ;;  %v822_v38 = vsub.f32 %v757_v11, %v806_v35  ;;  %v821_v39 = vsub.f32 %v754_v9, %v805_v36  ;;  %v825_v45 = vsub.f32 %v766_v15, %v809_v40 }
 0x366   :  { %v824_v46 = vsub.f32 %v763_v10, %v808_v41  ;;  %v827_v55 = vsub.f32 %v772_v25, %v811_v48  ;;  %v826_v56 = vsub.f32 %v769_v20, %v810_v51  ;;  %v828_v61 = vsub.f32 %v775_v22, %v812_v33 }
 0x367   :  { %v833_v42 = vmul.f32 1.442695, %v823_v37  ;;  %v831_v43 = vmul.f32 1.442695, %v822_v38  ;;  %v829_v44 = vmul.f32 1.442695, %v821_v39 }
 0x368   :  { %v837_v47 = vmul.f32 1.442695, %v825_v45  ;;  %v835_v50 = vmul.f32 1.442695, %v824_v46  ;;  %v841_v57 = vmul.f32 1.442695, %v827_v55 }
 0x369   :  { %1012 = vpow2.f32 %v833_v42  ;;  %v839_v59 = vmul.f32 1.442695, %v826_v56  ;;  %v843_v63 = vmul.f32 1.442695, %v828_v61 }
 0x36a   :  { %1014 = vpow2.f32 %v831_v43 }
 0x36b   :  { %1016 = vpow2.f32 %v829_v44 }
 0x36c   :  { %1018 = vpow2.f32 %v837_v47 }
 0x36d   :  { %1020 = vpow2.f32 %v835_v50 }
 0x36e   :  { %1022 = vpow2.f32 %v841_v57 }
 0x36f   :  { %v1792_v49 = vpop.eup %1012  ;;  %1024 = vpow2.f32 %v839_v59 }
 0x370   :  { %v1015_v52 = vpop.eup %1014  ;;  %860 = vperm.xlu1 %1010, %v1792_v49   ;;  %1026 = vpow2.f32 %v843_v63 }
 0x371   :  { %v1017_v53 = vpop.eup %1016  ;;  %857 = vperm.xlu0 %1009, %v1015_v52  }
 0x372   :  { %854 = vperm.xlu2 %1008, %v1017_v53   ;;  %v1019_v58 = vpop.eup %1018 }
 0x373   :  { %v1021_v60 = vpop.eup %1020 }
 0x374   :  { %v1023_v62 = vpop.eup %1022 }
 0x375   :  { %v1025_v0 = vpop.eup %1024 }
 0x376   :  { %v1027_v1 = vpop.eup %1026 }
 0x378   :  { %866 = vperm.xlu1 %1010, %v1019_v58  }
 0x37a   :  { %863 = vperm.xlu2 %1008, %v1021_v60  }
 0x380   :  { %872 = vperm.xlu1 %1010, %v1023_v62  }
 0x382   :  { %869 = vperm.xlu2 %1008, %v1025_v0  }
 0x38a   :  { %875 = vperm.xlu2 %1008, %v1027_v1  }
 0x3cc   :  { %v855_v2 = vpop.permute.xlu2 %854 }
 0x3cd   :  { %v877_v9 = vperm.slane %v855_v2, %v1085_v4 }
 0x3d4   :  { %v864_v3 = vpop.permute.xlu2 %863 }
 0x3d5   :  { %v880_v15 = vperm.slane %v864_v3, %v1085_v4 }
 0x3dc   :  { %v870_v8 = vpop.permute.xlu2 %869 }
 0x3dd   :  { %v882_v19 = vperm.slane %v870_v8, %v1085_v4 }
 0x3e2   :  { %v861_v5 = vpop.permute.xlu1 %860 }
 0x3e3   :  { %v858_v6 = vpop.permute.xlu0 %857  ;;  %v879_v10 = vperm.slane %v861_v5, %v1085_v4 }
 0x3e4   :  { %v878_v7 = vperm.slane %v858_v6, %v1085_v4  ;;  %v876_v17 = vpop.permute.xlu2 %875 }
 0x3e5   :  { %v884_v21 = vperm.slane %v876_v17, %v1085_v4 }
 0x3e6   :  { %v885_v11 = vsel %vm325_vm2, %v878_v7, %v877_v9 }
 0x3e7   :  { %v886_v13 = vsel %vm327_vm3, %v879_v10, %v885_v11 }
 0x3e8   :  { %v887_v16 = vsel %vm329_vm4, %v880_v15, %v886_v13 }
 0x3ea   :  { %v867_v12 = vpop.permute.xlu1 %866 }
 0x3eb   :  { %v881_v14 = vperm.slane %v867_v12, %v1085_v4 }
 0x3ed   :  { %v888_v18 = vsel %vm331_vm5, %v881_v14, %v887_v16 }
 0x3ee   :  { %v889_v22 = vsel %vm333_vm6, %v882_v19, %v888_v18 }
 0x3f2   :  { %v873_v54 = vpop.permute.xlu1 %872 }
 0x3f3   :  { %v883_v20 = vperm.slane %v873_v54, %v1085_v4 }
 0x3f5   :  { %v890_v23 = vsel %vm335_vm7, %v883_v20, %v889_v22 }
 0x3f6   :  { %v891_v24 = vsel %vm337_vm8, %v884_v21, %v890_v23 }
 0x3f7   :  { %v893_v25 = vsel %vm800_vm10, %v891_v24, 0.0 }
 0x3f8   :  { %894 = vadd.xlane.f32.xlu0 %v893_v25 }
 0x46b   :  { %v895_v26 = vpop.xlane.xlu0 %894 }
 0x46c   :  { %1028 = vrcp.f32 %v895_v26 }
 0x472   :  { %v1029_v27 = vpop.eup %1028 }
 0x473   :  { %v899_v28 = vperm.slane %v1029_v27, 1  ;;  %v898_v29 = vperm.slane %v1029_v27, 0  ;;  %v901_v32 = vperm.slane %v1029_v27, 3  ;;  %v900_v34 = vperm.slane %v1029_v27, 2 }
 0x474   :  { %v903_v37 = vperm.slane %v1029_v27, 5  ;;  %v902_v38 = vperm.slane %v1029_v27, 4  ;;  %v905_v41 = vperm.slane %v1029_v27, 7  ;;  %v904_v42 = vperm.slane %v1029_v27, 6 }
 0x475   :  { %v915_v30 = vmul.f32 %v1015_v52, %v899_v28  ;;  %v914_v31 = vmul.f32 %v1017_v53, %v898_v29  ;;  %v917_v35 = vmul.f32 %v1021_v60, %v901_v32  ;;  %v916_v36 = vmul.f32 %v1792_v49, %v900_v34 }
 0x476   :  { %v919_v39 = vmul.f32 %v1025_v0, %v903_v37  ;;  %v918_v40 = vmul.f32 %v1019_v58, %v902_v38  ;;  %v921_v43 = vmul.f32 %v1027_v1, %v905_v41  ;;  %v920_v44 = vmul.f32 %v1023_v62, %v904_v42 }
 0x477   :  { %934 = vperm.xlu2 %1008, %v915_v30   ;;  %931 = vperm.xlu1 %1010, %v914_v31  }
 0x47f   :  { %940 = vperm.xlu2 %1008, %v917_v35   ;;  %937 = vperm.xlu1 %1010, %v916_v36  }
 0x487   :  { %946 = vperm.xlu2 %1008, %v919_v39   ;;  %943 = vperm.xlu1 %1010, %v918_v40  }
 0x48f   :  { %952 = vperm.xlu2 %1008, %v921_v43   ;;  %949 = vperm.xlu1 %1010, %v920_v44  }
 0x4d1   :  { %v935_v45 = vpop.permute.xlu2 %934 }
 0x4d2   :  { %v955_v52 = vperm.slane %v935_v45, %v1085_v4 }
 0x4d9   :  { %v941_v47 = vpop.permute.xlu2 %940 }
 0x4da   :  { %v957_v58 = vperm.slane %v941_v47, %v1085_v4 }
 0x4e1   :  { %v947_v50 = vpop.permute.xlu2 %946 }
 0x4e2   :  { %v959_v61 = vperm.slane %v947_v50, %v1085_v4 }
 0x4e9   :  { %v932_v46 = vpop.permute.xlu1 %931  ;;  %v953_v33 = vpop.permute.xlu2 %952 }
 0x4ea   :  { %v954_v49 = vperm.slane %v932_v46, %v1085_v4  ;;  %v961_v0 = vperm.slane %v953_v33, %v1085_v4 }
 0x4ec   :  { %v962_v55 = vsel %vm325_vm2, %v955_v52, %v954_v49 }
 0x4f1   :  { %v938_v48 = vpop.permute.xlu1 %937 }
 0x4f2   :  { %v956_v51 = vperm.slane %v938_v48, %v1085_v4 }
 0x4f4   :  { %v963_v56 = vsel %vm327_vm3, %v956_v51, %v962_v55 }
 0x4f5   :  { %v964_v59 = vsel %vm329_vm4, %v957_v58, %v963_v56 }
 0x4f9   :  { %v944_v53 = vpop.permute.xlu1 %943 }
 0x4fa   :  { %v958_v57 = vperm.slane %v944_v53, %v1085_v4 }
 0x4fc   :  { %v965_v60 = vsel %vm331_vm5, %v958_v57, %v964_v59 }
 0x4fd   :  { %v966_v1 = vsel %vm333_vm6, %v959_v61, %v965_v60 }
 0x501   :  { %v950_v62 = vpop.permute.xlu1 %949 }
 0x502   :  { %v960_v63 = vperm.slane %v950_v62, %v1085_v4 }
 0x504   :  { %v967_v2 = vsel %vm335_vm7, %v960_v63, %v966_v1 }
 0x505   :  { %v968_v3 = vsel %vm337_vm8, %v961_v0, %v967_v2 }
 0x506   :  { %970 = vst.msk [vmem:[%s1840_s9] sm:$0xff] %vm800_vm10, %v968_v3 }

</bundles_post_ra>
